<compile_context>
chip_gen: v7x
topology: tpu7x:2x2x1
jax: 0.10.0
libtpu: 0.0.40
codegen_flags: <defaults>
</compile_context>

<pallas_src>
import jax
import jax.numpy as jnp
from jax.experimental import pallas as pl
from jax.experimental.pallas import tpu as pltpu

# Synthetic irreps definition (encodes shapes only):
#   scalars = 8x0e, gates = 4x0e (one per gated irrep), gated = 2x1e + 2x2e
IRREPS_SCALARS = [(8, 0)]           # (multiplicity, l)
IRREPS_GATES   = [(4, 0)]
IRREPS_GATED   = [(2, 1), (2, 2)]   # 2*3 + 2*5 = 16 components, 4 irreps

D_S     = sum(m * (2 * l + 1) for m, l in IRREPS_SCALARS)    # 8
D_G     = sum(m * (2 * l + 1) for m, l in IRREPS_GATES)      # 4
D_GATED = sum(m * (2 * l + 1) for m, l in IRREPS_GATED)      # 16
N_GATED_IRREPS = sum(m for m, _ in IRREPS_GATED)             # 4
assert D_G == N_GATED_IRREPS, "one gate scalar per gated irrep"
D_IN  = D_S + D_G + D_GATED                                  # 28
D_OUT = D_S + D_GATED                                        # 24

# Per-gated-irrep component dims and the start offset of each irrep's segment.
_GATED_DIMS = [2 * l + 1 for m, l in IRREPS_GATED for _ in range(m)]      # [3,3,5,5]
_SEG_STARTS = [0]
for _dim in _GATED_DIMS[:-1]:
    _SEG_STARTS.append(_SEG_STARTS[-1] + _dim)                            # [0,3,6,11]
_GATE_IDX = [g for g, _dim in enumerate(_GATED_DIMS) for _ in range(_dim)]  # host-side ref


# --------------------------------------------------------------------------- helpers
def _sigmoid(x):
    # exp -> EUP slot; approx reciprocal -> EUP vrcp.  No VALU divide, which is
    # what binds on v7x once the kernel is lane-dense.
    return pl.reciprocal(1.0 + jnp.exp(-x), approx=True)


def _expand_matrix(dtype, transpose=False):
    """One-hot expansion E with E[k, g] = 1 iff gated component k belongs to
    gated irrep g (shape (D_GATED, D_G), or transposed).

    Built in-kernel from iota + compares: no dense constant, no extra DMA'd
    input.  The tiny MXU matmul that consumes it replaces the non-8/128-aligned
    broadcast+concat (XLU work); the MXU slot is otherwise idle here.
    """
    shape = (D_G, D_GATED) if transpose else (D_GATED, D_G)
    comp_ax = 1 if transpose else 0
    gate_ax = 1 - comp_ax
    k = jax.lax.broadcasted_iota(jnp.int32, shape, comp_ax)
    g = jax.lax.broadcasted_iota(jnp.int32, shape, gate_ax)
    gate_of_k = jnp.zeros(shape, jnp.int32)
    for start in _SEG_STARTS[1:]:          # static python ints, unrolled at trace
        gate_of_k = gate_of_k + (k >= start).astype(jnp.int32)
    return (gate_of_k == g).astype(dtype)


def _min_rows(dtype):
    """Minimum legal sublane tile: 8 for 4-byte, 16 for 2-byte, 32 for 1-byte."""
    return 32 // jnp.dtype(dtype).itemsize


def _pick_tile(n, cap, align):
    """Pick the block length along the tiled axis.

    - never exceeds `cap`, always a multiple of `align` unless it covers the
      whole axis (full-dim blocks are always layout-legal),
    - splits the axis into >= 2 grid steps whenever possible so both v7x
      TensorCores get work under dimension_semantics=("parallel",).
    Ragged last blocks are fine (grid uses pl.cdiv; Pallas masks them).
    """
    if n <= align:
        return n
    half = pl.cdiv(pl.cdiv(n, 2), align) * align
    tile = min(cap, half)
    tile = max((tile // align) * align, align)
    return tile


def _cost(n_rows, itemsize):
    return pl.CostEstimate(
        flops=n_rows * (4 * D_S + 4 * D_G + 2 * D_GATED * D_G + D_GATED),
        transcendentals=n_rows * (D_S + D_G),
        bytes_accessed=n_rows * (D_IN + D_OUT) * itemsize,
    )


# --------------------------------------------------------------------------- kernels
def _gate_kernel_rows(x_ref, o_ref):
    """Features-last tile: x (TN, D_IN) -> o (TN, D_OUT).

    Lane-starved (28/24 of 128 lanes); kept for drop-in layout compatibility.
    Prefer the lane-dense kernel when the producer can emit (D_IN, N).
    """
    x = x_ref[...]                                 # compute in input dtype
    scalars = x[:, :D_S]
    gates   = x[:, D_S:D_S + D_G]
    gated   = x[:, D_S + D_G:]
    gate_b = jnp.dot(_sigmoid(gates), _expand_matrix(x.dtype, transpose=True),
                     preferred_element_type=jnp.float32).astype(x.dtype)
    # Single store per tile (v5e has only one vector-store slot per bundle).
    out = jnp.concatenate([scalars * _sigmoid(scalars), gated * gate_b], axis=-1)
    o_ref[...] = out.astype(o_ref.dtype)


def _gate_kernel_lane_dense(x_ref, o_ref):
    """Feature-first tile: x (D_IN, TL) -> o (D_OUT, TL); TL on the 128-lane axis."""
    x = x_ref[...]
    scalars = x[:D_S, :]
    gates   = x[D_S:D_S + D_G, :]
    gated   = x[D_S + D_G:, :]
    gate_b = jnp.dot(_expand_matrix(x.dtype), _sigmoid(gates),
                     preferred_element_type=jnp.float32).astype(x.dtype)
    # Both stores are full lane width at sublane offsets 0 and 8 (aligned).
    o_ref[:D_S, :] = (scalars * _sigmoid(scalars)).astype(o_ref.dtype)
    o_ref[D_S:, :] = (gated * gate_b).astype(o_ref.dtype)


def _silu_kernel(x_ref, o_ref):
    """Degenerate branch (no gated irreps): plain SiLU."""
    x = x_ref[...]
    o_ref[...] = (x * _sigmoid(x)).astype(o_ref.dtype)


# --------------------------------------------------------------------------- wrappers
def _silu_forward(x, *, tile_rows=4096):
    """Plain SiLU (module's degenerate branch).

    Elementwise, so layout is free: view the data lane-dense (last dim 128)
    whenever the element count allows, avoiding the d_in/128-lane problem.
    """
    N, d = x.shape
    total = N * d
    if total % 128 == 0:
        rows, lanes = total // 128, 128
        xv = x.reshape(rows, lanes)
    else:
        rows, lanes = N, d
        xv = x
    tile = _pick_tile(rows, tile_rows, _min_rows(x.dtype))
    out = pl.pallas_call(
        _silu_kernel,
        out_shape=jax.ShapeDtypeStruct((rows, lanes), x.dtype),
        grid_spec=pltpu.PrefetchScalarGridSpec(
            num_scalar_prefetch=0, grid=(pl.cdiv(rows, tile),),
            in_specs=[pl.BlockSpec((tile, lanes), lambda i: (i, 0))],
            out_specs=pl.BlockSpec((tile, lanes), lambda i: (i, 0)),
        ),
        compiler_params=pltpu.CompilerParams(dimension_semantics=("parallel",)),
        cost_estimate=pl.CostEstimate(
            flops=4 * total, transcendentals=total,
            bytes_accessed=2 * total * x.dtype.itemsize),
    )(xv)
    return out.reshape(N, d)


def o3_swish_gate(x, *, tile_n=4096):
    """Features-last layout (same as the PyTorch module): x [N, D_IN] -> [N, D_OUT].

    tile_n=4096: the 28/24-wide f32 block is lane-padded to 128 in VMEM, so the
    double-buffered in+out footprint is ~8 MiB — under v5e's 16 MiB scoped
    default (the old 8192 default was ~16 MiB and collided with it).
    """
    N, d_in = x.shape

    if N_GATED_IRREPS == 0:          # module degenerates to plain SiLU
        return _silu_forward(x, tile_rows=tile_n)

    assert d_in == D_IN
    tile = _pick_tile(N, tile_n, _min_rows(x.dtype))
    grid = (pl.cdiv(N, tile),)       # ragged last block is masked by Pallas
    return pl.pallas_call(
        _gate_kernel_rows,
        out_shape=jax.ShapeDtypeStruct((N, D_OUT), x.dtype),
        grid_spec=pltpu.PrefetchScalarGridSpec(
            num_scalar_prefetch=0, grid=grid,
            in_specs=[pl.BlockSpec((tile, D_IN), lambda i: (i, 0))],
            out_specs=pl.BlockSpec((tile, D_OUT), lambda i: (i, 0)),
        ),
        compiler_params=pltpu.CompilerParams(dimension_semantics=("parallel",)),
        cost_estimate=_cost(N, x.dtype.itemsize),
    )(x)


def o3_swish_gate_lane_dense(xt, *, tile_l=16384):
    """PRIMARY path. Feature-first layout (D_IN, N) -> (D_OUT, N); N on the lane axis.

    Full-width vregs and unmasked stores (vs. 28/24-of-128 lanes features-last).
    tile_l=16384 -> ~8 MiB double-buffered (28/24 sublanes pad to 32), fits every
    generation's scoped VMEM default; v7x can push 32768 (~16 MiB, 64 MiB VMEM).
    """
    # TODO(synk): best case is fusing this op into the producing kernel so the
    # 24-wide output never round-trips HBM at all.
    d_in, N = xt.shape
    assert d_in == D_IN
    tile = _pick_tile(N, tile_l, 128)
    grid = (pl.cdiv(N, tile),)
    return pl.pallas_call(
        _gate_kernel_lane_dense,
        out_shape=jax.ShapeDtypeStruct((D_OUT, N), xt.dtype),
        grid_spec=pltpu.PrefetchScalarGridSpec(
            num_scalar_prefetch=0, grid=grid,
            in_specs=[pl.BlockSpec((D_IN, tile), lambda i: (0, i))],
            out_specs=pl.BlockSpec((D_OUT, tile), lambda i: (0, i)),
        ),
        compiler_params=pltpu.CompilerParams(dimension_semantics=("parallel",)),
        cost_estimate=_cost(N, xt.dtype.itemsize),
    )(xt)


# --------------------------------------------------------------------------- reference
def _reference(x):
    scalars = x[:, :D_S]
    gates   = x[:, D_S:D_S + D_G]
    gated   = x[:, D_S + D_G:]
    silu = scalars * jax.nn.sigmoid(scalars)
    sig  = jax.nn.sigmoid(gates)
    gate_b = jnp.take(sig, jnp.array(_GATE_IDX, dtype=jnp.int32), axis=-1)
    return jnp.concatenate([silu, gated * gate_b], axis=-1)


if __name__ == "__main__":
    key = jax.random.PRNGKey(0)
    N = 320                                   # small demo size; not a multiple of 128
    x = jax.random.normal(key, (N, D_IN), dtype=jnp.float32)
    ref = _reference(x)
    # sigmoid uses the EUP approx reciprocal, so compare with a modest tolerance
    tol = dict(atol=2e-2, rtol=2e-2)

    # 1) features-last, default tile (picks a 2-step grid for megacore).
    out = jax.block_until_ready(o3_swish_gate(x))
    assert out.shape == (N, D_OUT)
    assert jnp.allclose(out, ref, **tol), "mismatch (features-last, default tile)"

    # 2) features-last, multi-block grid with a ragged last block (320 = 2*128 + 64).
    out2 = jax.block_until_ready(o3_swish_gate(x, tile_n=128))
    assert jnp.allclose(out2, ref, **tol), "mismatch (features-last, tiled + ragged)"

    # 3) lane-dense feature-first variant, default tile (2-step grid: 256 + ragged 64).
    #    (transpose here is test-only; a fused producer would emit this layout directly)
    xt = x.T
    out3 = jax.block_until_ready(o3_swish_gate_lane_dense(xt))
    assert out3.shape == (D_OUT, N)
    assert jnp.allclose(out3.T, ref, **tol), "mismatch (lane-dense, default tile)"

    # 4) lane-dense with a 128-lane tile and a ragged last block.
    out4 = jax.block_until_ready(o3_swish_gate_lane_dense(xt, tile_l=128))
    assert jnp.allclose(out4.T, ref, **tol), "mismatch (lane-dense, tiled + ragged)"

    # 5) degenerate (no gated irreps) branch: plain SiLU via the lane-dense view.
    out5 = jax.block_until_ready(_silu_forward(x))
    assert jnp.allclose(out5, x * jax.nn.sigmoid(x), **tol), "mismatch (SiLU branch)"

    print("KERNEL_OK")
</pallas_src>

<mosaic_0001>
module attributes {stable_mosaic.version = 11 : i64} {
  func.func @_gate_kernel_rows(%arg0: i32, %arg1: memref<160x28xf32, #tpu.memory_space<vmem>>, %arg2: memref<160x24xf32, #tpu.memory_space<vmem>>) attributes {dimension_semantics = [#tpu.dimension_semantics<parallel>], iteration_bounds = array<i64: 2>, scalar_prefetch = 0 : i64, scratch_operands = 0 : i64, tpu.core_type = #tpu.core_type<tc>, window_params = [{transform_indices = @transform_0, window_bounds = array<i64: 160, 28>}, {transform_indices = @transform_1, window_bounds = array<i64: 160, 24>}]} {
    %c0 = arith.constant 0 : index
    %c0_0 = arith.constant 0 : index
    %0 = vector.load %arg1[%c0, %c0_0] : memref<160x28xf32, #tpu.memory_space<vmem>>, vector<160x28xf32>
    %1 = vector.extract_strided_slice %0 {offsets = [0, 0], sizes = [160, 8], strides = [1, 1]} : vector<160x28xf32> to vector<160x8xf32>
    %2 = vector.extract_strided_slice %0 {offsets = [0, 8], sizes = [160, 4], strides = [1, 1]} : vector<160x28xf32> to vector<160x4xf32>
    %3 = vector.extract_strided_slice %0 {offsets = [0, 12], sizes = [160, 16], strides = [1, 1]} : vector<160x28xf32> to vector<160x16xf32>
    %cst = arith.constant 0.000000e+00 : f32
    %4 = vector.broadcast %cst : f32 to vector<160x4xf32>
    %5 = arith.subf %4, %2 : vector<160x4xf32>
    %6 = math.exp %5 : vector<160x4xf32>
    %cst_1 = arith.constant 1.000000e+00 : f32
    %7 = vector.broadcast %cst_1 : f32 to vector<160x4xf32>
    %8 = arith.addf %7, %6 : vector<160x4xf32>
    %9 = tpu.reciprocal %8 {approx = true} : vector<160x4xf32> -> vector<160x4xf32>
    %10 = tpu.iota {dimensions = array<i32: 1>} : vector<4x16xi32>
    %11 = tpu.iota {dimensions = array<i32: 0>} : vector<4x16xi32>
    %c0_i32 = arith.constant 0 : i32
    %12 = vector.broadcast %c0_i32 : i32 to vector<4x16xi32>
    %c3_i32 = arith.constant 3 : i32
    %13 = vector.broadcast %c3_i32 : i32 to vector<4x16xi32>
    %14 = arith.cmpi sge, %10, %13 : vector<4x16xi32>
    %15 = arith.extui %14 : vector<4x16xi1> to vector<4x16xi32>
    %16 = arith.addi %12, %15 : vector<4x16xi32>
    %c6_i32 = arith.constant 6 : i32
    %17 = vector.broadcast %c6_i32 : i32 to vector<4x16xi32>
    %18 = arith.cmpi sge, %10, %17 : vector<4x16xi32>
    %19 = arith.extui %18 : vector<4x16xi1> to vector<4x16xi32>
    %20 = arith.addi %16, %19 : vector<4x16xi32>
    %c11_i32 = arith.constant 11 : i32
    %21 = vector.broadcast %c11_i32 : i32 to vector<4x16xi32>
    %22 = arith.cmpi sge, %10, %21 : vector<4x16xi32>
    %23 = arith.extui %22 : vector<4x16xi1> to vector<4x16xi32>
    %24 = arith.addi %20, %23 : vector<4x16xi32>
    %25 = arith.cmpi eq, %24, %11 : vector<4x16xi32>
    %26 = arith.extui %25 : vector<4x16xi1> to vector<4x16xi32>
    %27 = arith.sitofp %26 : vector<4x16xi32> to vector<4x16xf32>
    %cst_2 = arith.constant dense<0.000000e+00> : vector<160x16xf32>
    %28 = tpu.matmul %9, %27, %cst_2 {dimension_numbers = #tpu.dot_dimension_numbers<[1], [0], [0], [1], [0, 0, 1, 1], [], []>} : vector<160x4xf32>, vector<4x16xf32>, vector<160x16xf32> -> vector<160x16xf32>
    %cst_3 = arith.constant 0.000000e+00 : f32
    %29 = vector.broadcast %cst_3 : f32 to vector<160x8xf32>
    %30 = arith.subf %29, %1 : vector<160x8xf32>
    %31 = math.exp %30 : vector<160x8xf32>
    %cst_4 = arith.constant 1.000000e+00 : f32
    %32 = vector.broadcast %cst_4 : f32 to vector<160x8xf32>
    %33 = arith.addf %32, %31 : vector<160x8xf32>
    %34 = tpu.reciprocal %33 {approx = true} : vector<160x8xf32> -> vector<160x8xf32>
    %35 = arith.mulf %1, %34 : vector<160x8xf32>
    %36 = arith.mulf %3, %28 : vector<160x16xf32>
    %37 = tpu.concatenate %35, %36 in 1 : vector<160x8xf32>, vector<160x16xf32> -> vector<160x24xf32>
    %c0_5 = arith.constant 0 : index
    %c0_6 = arith.constant 0 : index
    %38 = vector.load %arg2[%c0_5, %c0_6] : memref<160x24xf32, #tpu.memory_space<vmem>>, vector<160x24xf32>
    tpu.vector_store %arg2[%c0_5, %c0_6], %37 {strides = array<i32>} : memref<160x24xf32, #tpu.memory_space<vmem>>, vector<160x24xf32>,
    return
  }
  func.func @transform_0(%arg0: i32) -> (i32, i32) {
    %c0_i32 = arith.constant 0 : i32
    %c0_i32_0 = arith.constant 0 : i32
    return %arg0, %c0_i32 : i32, i32
  }
  func.func @transform_1(%arg0: i32) -> (i32, i32) {
    %c0_i32 = arith.constant 0 : i32
    %c0_i32_0 = arith.constant 0 : i32
    return %arg0, %c0_i32 : i32, i32
  }
}

</mosaic_0001>

<bundles_post_ra>
// kernel: tpu_custom_call.1
= control target key start
LH: loop header
LB: loop body
LE: loop exit
PB: predicated region body
PF: predicated region fallthrough
CT: control target
= control target key end

     0   :  { %s1025_s6 = smov 0   ;;  %s1397_s0 = inlined_call_operand.vmem [shape: f32[320,28], index: 0, kind: input, shape index: {}]   ;;  %s1398_s1 = inlined_call_operand.vmem [shape: f32[320,24], index: 1, kind: output, shape index: {}]  }
   0x1 LB: > { %s823_s7 = sadd.s32 4294967295, %s1008_s6   ;;  %p827_p0 = scmp.ge.s32.totalorder %s1008_s6, 1  ;;  %s1008_s6 = sphi %s1025_s6, %s11_s6  }
   0x2   : > { %p88_p1 = scmp.lt.s32.totalorder %s1008_s6, 3 }
   0x4   : > { %p89_p2 = pnand %p827_p0, %p88_p1 }
   0x5   : > { %s108_s8 = smul.u32 (!%p89_p2), 20, %s823_s7  ;;  %v240_v38 = vlaneseq (!%p89_p2)  ;;  %v1010_v51 = vmov (!%p89_p2), 0   ;;  %vm356_vm3 = vcmask (!%p89_p2), 1043456   ;;  %s1012_s13 = smov (!%p89_p2), 120   ;;  %vm315_vm5 = vcmask (!%p89_p2), 31744  }
   0x6   : > { %92 = sbr.rel (%p89_p2) target bundleno = 647 (0x287), region = 24  ;;  %s1013_s14 = smov (!%p89_p2), 12   ;;  %vm725_vm6 = vcmask (!%p89_p2), 64512   ;;  %vm746_vm7 = vcmask (!%p89_p2), 195584  }
   0x7   : > { %p109_p3 = scmp.lt.s32.totalorder (!%p89_p2), %s108_s8, 39  ;;  %v241_v42 = vand.u32 (!%p89_p2), 127, %v240_v38  ;;  %v243_v46 = vshrl.u32 (!%p89_p2), %v240_v38, 7  ;;  %s1014_s15 = smov (!%p89_p2), 124  }
   0x9   : > { %vm244_vm0 = vcmp.ge.s32.totalorder (!%p89_p2), %v241_v42, 3  ;;  %vm246_vm1 = vcmp.ge.s32.totalorder (!%p89_p2), %v241_v42, 6  ;;  %vm249_vm2 = vcmp.ge.s32.totalorder (!%p89_p2), %v241_v42, 11 }
   0xa   : > { %v245_v52 = vsel (!%p89_p2), %vm244_vm0, 1, %v1010_v51  ;;  %v247_v53 = vsel (!%p89_p2), %vm246_vm1, 1, %v1010_v51  ;;  %v250_v61 = vsel (!%p89_p2), %vm249_vm2, 1, %v1010_v51 }
   0xb   : > { %v248_v57 = vadd.s32 (!%p89_p2), %v247_v53, %v245_v52 }
   0xd   : > { %s1400_s8 = smov (!%p109_p3, %s108_s8), 39 }
   0xe   : > { %s828_s9 = sshll.u32 %s1400_s8, 3 }
   0xf   : > { %s1041_s12 = scalar_lea.vmem %s1397_s0, %s828_s9  ;;  %s1296_s18 = scalar_lea.vmem %s1398_s1, %s828_s9 }
  0x10   : > { %v1044_v0 = vld [vmem:[%s1041_s12] sm:$0xff]  ;;  %v1047_v1 = vld [vmem:[%s1041_s12 + $0x8] sm:$0xff]  ;;  %v1050_v2 = vld [vmem:[%s1041_s12 + $0x50] sm:$0xff] }
  0x11   : > { %v140_v3 = vsub.f32 0.0, %v1044_v0  ;;  %v141_v4 = vsub.f32 0.0, %v1047_v1  ;;  %v150_v5 = vsub.f32 0.0, %v1050_v2  ;;  %v1056_v6 = vld [vmem:[%s1041_s12 + $0x58] sm:$0xff]  ;;  %v1059_v7 = vld [vmem:[%s1041_s12 + $0x10] sm:$0xff]  ;;  %v1062_v8 = vld [vmem:[%s1041_s12 + $0x60] sm:$0xff] }
  0x12   : > { %v151_v9 = vsub.f32 0.0, %v1056_v6  ;;  %v142_v10 = vsub.f32 0.0, %v1059_v7  ;;  %v152_v11 = vsub.f32 0.0, %v1062_v8  ;;  %v1068_v12 = vld [vmem:[%s1041_s12 + $0x18] sm:$0xff]  ;;  %v1071_v13 = vld [vmem:[%s1041_s12 + $0x68] sm:$0xff]  ;;  %v1074_v14 = vld [vmem:[%s1041_s12 + $0x20] sm:$0xff] }
  0x13   : > { %v160_v15 = vmul.f32 1.442695, %v140_v3  ;;  %v162_v16 = vmul.f32 1.442695, %v141_v4  ;;  %v180_v17 = vmul.f32 1.442695, %v150_v5  ;;  %v251_v4 = vadd.s32 %v250_v61, %v248_v57 }
  0x14   : > { %v182_v18 = vmul.f32 1.442695, %v151_v9  ;;  %v164_v19 = vmul.f32 1.442695, %v142_v10  ;;  %v143_v20 = vsub.f32 0.0, %v1068_v12  ;;  %v153_v21 = vsub.f32 0.0, %v1071_v13 }
  0x15   : > { %922 = vpow2.f32 %v160_v15  ;;  %v144_v22 = vsub.f32 0.0, %v1074_v14  ;;  %v1080_v23 = vld [vmem:[%s1041_s12 + $0x70] sm:$0xff]  ;;  %v1083_v24 = vld [vmem:[%s1041_s12 + $0x28] sm:$0xff]  ;;  %v1086_v25 = vld [vmem:[%s1041_s12 + $0x78] sm:$0xff]  ;;  %v184_v26 = vmul.f32 1.442695, %v152_v11  ;;  %vm252_vm4 = vcmp.eq.s32.totalorder %v251_v4, %v243_v46 }
  0x16   : > { %924 = vpow2.f32 %v162_v16  ;;  %v154_v27 = vsub.f32 0.0, %v1080_v23  ;;  %v166_v28 = vmul.f32 1.442695, %v143_v20  ;;  %v145_v29 = vsub.f32 0.0, %v1083_v24  ;;  %v1092_v34 = vld [vmem:[%s1041_s12 + $0x30] sm:$0xff]  ;;  %v1096_v56 = vld [vmem:[%s1041_s12 + $0x80] sm:$0xff] }
  0x17   : > { %926 = vpow2.f32 %v180_v17  ;;  %v186_v30 = vmul.f32 1.442695, %v153_v21  ;;  %v155_v31 = vsub.f32 0.0, %v1086_v25  ;;  %v168_v32 = vmul.f32 1.442695, %v144_v22  ;;  %v1099_v60 = vld [vmem:[%s1041_s12 + $0x38] sm:$0xff] }
  0x18   : > { %928 = vpow2.f32 %v182_v18  ;;  %v188_v33 = vmul.f32 1.442695, %v154_v27  ;;  %v170_v35 = vmul.f32 1.442695, %v145_v29  ;;  %v146_v37 = vsub.f32 0.0, %v1092_v34  ;;  %v1102_v3 = vld [vmem:[%s1041_s12 + $0x88] sm:$0xff] }
  0x19   : > { %930 = vpow2.f32 %v164_v19  ;;  %v190_v36 = vmul.f32 1.442695, %v155_v31  ;;  %v156_v10 = vsub.f32 0.0, %v1096_v56  ;;  %v1106_v11 = vld [vmem:[%s1041_s12 + $0x40] sm:$0xff]  ;;  %v147_v17 = vsub.f32 0.0, %v1099_v60  ;;  %v1110_v18 = vld [vmem:[%s1041_s12 + $0x90] sm:$0xff] }
  0x1a   : > { %932 = vpow2.f32 %v184_v26  ;;  %v172_v45 = vmul.f32 1.442695, %v146_v37  ;;  %v157_v21 = vsub.f32 0.0, %v1102_v3  ;;  %v1114_v22 = vld [vmem:[%s1041_s12 + $0x48] sm:$0xff]  ;;  %v1011_v26 = vmov 0.0   ;;  %v1118_v31 = vld [vmem:[%s1041_s12 + $0x98] sm:$0xff] }
  0x1b   : > { %934 = vpow2.f32 %v166_v28  ;;  %v830_v27 = vsel %vm252_vm4, 1.0, %v1011_v26  ;;  %v174_v37 = vmul.f32 1.442695, %v147_v17  ;;  %v149_v38 = vsub.f32 0.0, %v1114_v22 }
  0x1c   : > { %936 = vpow2.f32 %v186_v30  ;;  %v148_v30 = vsub.f32 0.0, %v1106_v11  ;;  %875 = vmatprep.subr.msk.mxu0 %vm356_vm3, %v830_v27  ;;  %907 = vmatprep.subr.msk.mxu1 %vm356_vm3, %v830_v27 }
  0x1d   : > { %938 = vpow2.f32 %v168_v32  ;;  %876 = vmatpush3.msk.msra.mxu0 %vm356_vm3, %v830_v27  ;;  %908 = vmatpush3.msk.msra.mxu1 %vm356_vm3, %v830_v27 }
  0x1e   : > { %940 = vpow2.f32 %v188_v33  ;;  %v192_v33 = vmul.f32 1.442695, %v156_v10 }
  0x1f   : > { %v923_v39 = vpop.eup %922  ;;  %942 = vpow2.f32 %v170_v35  ;;  %v158_v35 = vsub.f32 0.0, %v1110_v18 }
  0x20   : > { %v925_v40 = vpop.eup %924  ;;  %v200_v41 = vadd.f32 1.0, %v923_v39  ;;  %944 = vpow2.f32 %v190_v36 }
  0x21   : > { %v927_v43 = vpop.eup %926  ;;  %v201_v44 = vadd.f32 1.0, %v925_v40  ;;  %v194_v40 = vmul.f32 1.442695, %v157_v21 }
  0x22   : > { %v929_v47 = vpop.eup %928  ;;  %946 = vrcp.f32 %v200_v41  ;;  %v210_v48 = vadd.f32 1.0, %v927_v43  ;;  %v159_v41 = vsub.f32 0.0, %v1118_v31  ;;  %v176_v43 = vmul.f32 1.442695, %v148_v30 }
  0x23   : > { %v931_v49 = vpop.eup %930  ;;  %948 = vrcp.f32 %v201_v44  ;;  %v211_v50 = vadd.f32 1.0, %v929_v47  ;;  %v178_v47 = vmul.f32 1.442695, %v149_v38 }
  0x24   : > { %v933_v54 = vpop.eup %932  ;;  %950 = vrcp.f32 %v210_v48  ;;  %v202_v55 = vadd.f32 1.0, %v931_v49  ;;  %v198_v49 = vmul.f32 1.442695, %v159_v41 }
  0x25   : > { %v935_v58 = vpop.eup %934  ;;  %952 = vrcp.f32 %v211_v50  ;;  %v212_v59 = vadd.f32 1.0, %v933_v54 }
  0x26   : > { %v937_v62 = vpop.eup %936  ;;  %v203_v63 = vadd.f32 1.0, %v935_v58  ;;  %954 = vpow2.f32 %v172_v45  ;;  %v196_v45 = vmul.f32 1.442695, %v158_v35 }
  0x27   : > { %v939_v5 = vpop.eup %938  ;;  %956 = vrcp.f32 %v202_v55  ;;  %v213_v9 = vadd.f32 1.0, %v937_v62 }
  0x28   : > { %v941_v15 = vpop.eup %940  ;;  %958 = vrcp.f32 %v212_v59  ;;  %v204_v16 = vadd.f32 1.0, %v939_v5 }
  0x29   : > { %v943_v19 = vpop.eup %942  ;;  %960 = vrcp.f32 %v203_v63  ;;  %v214_v20 = vadd.f32 1.0, %v941_v15 }
  0x2a   : > { %v945_v28 = vpop.eup %944  ;;  %962 = vrcp.f32 %v213_v9  ;;  %v205_v29 = vadd.f32 1.0, %v943_v19 }
  0x2b   : > { %964 = vrcp.f32 %v204_v16  ;;  %v215_v32 = vadd.f32 1.0, %v945_v28 }
  0x2c   : > { %v1125_v36 = vpop.eup %946  ;;  %966 = vrcp.f32 %v214_v20 }
  0x2d   : > { %v1128_v39 = vpop.eup %948  ;;  %275 = vrot.lane.b32.xlu0 %v1125_v36, %s1012_s13  ;;  %968 = vrcp.f32 %v205_v29 }
  0x2e   : > { %v1133_v42 = vpop.eup %950  ;;  %277 = vrot.lane.b32.xlu1 %v1128_v39, %s1012_s13  ;;  %970 = vrcp.f32 %v215_v32 }
  0x2f   : > { %v1137_v44 = vpop.eup %952  ;;  %972 = vpow2.f32 %v192_v33 }
  0x30   : > { %v955_v46 = vpop.eup %954  ;;  %974 = vpow2.f32 %v174_v37 }
  0x31   : > { %v1139_v48 = vpop.eup %956  ;;  %295 = vrot.lane.b32.xlu0 %v1133_v42, %s1012_s13  ;;  %976 = vpow2.f32 %v194_v40  ;;  %v206_v53 = vadd.f32 1.0, %v955_v46 }
  0x32   : > { %v1143_v50 = vpop.eup %958  ;;  %297 = vrot.lane.b32.xlu1 %v1137_v44, %s1012_s13  ;;  %978 = vpow2.f32 %v176_v43 }
  0x33   : > { %v1147_v51 = vpop.eup %960  ;;  %980 = vpow2.f32 %v196_v45 }
  0x34   : > { %v1149_v52 = vpop.eup %962  ;;  %982 = vpow2.f32 %v178_v47 }
  0x35   : > { %v1151_v54 = vpop.eup %964  ;;  %279 = vrot.lane.b32.xlu0 %v1139_v48, %s1012_s13  ;;  %984 = vpow2.f32 %v198_v49 }
  0x36   : > { %v1155_v55 = vpop.eup %966  ;;  %299 = vrot.lane.b32.xlu1 %v1143_v50, %s1012_s13  ;;  %986 = vrcp.f32 %v206_v53 }
  0x37   : > { %v1159_v57 = vpop.eup %968 }
  0x38   : > { %v1161_v58 = vpop.eup %970 }
  0x39   : > { %v973_v59 = vpop.eup %972  ;;  %281 = vrot.lane.b32.xlu0 %v1147_v51, %s1012_s13 }
  0x3a   : > { %v975_v61 = vpop.eup %974  ;;  %301 = vrot.lane.b32.xlu1 %v1149_v52, %s1012_s13  ;;  %v216_v62 = vadd.f32 1.0, %v973_v59 }
  0x3b   : > { %v977_v63 = vpop.eup %976  ;;  %v207_v4 = vadd.f32 1.0, %v975_v61 }
  0x3c   : > { %v979_v5 = vpop.eup %978  ;;  %988 = vrcp.f32 %v216_v62  ;;  %v217_v9 = vadd.f32 1.0, %v977_v63 }
  0x3d   : > { %v981_v10 = vpop.eup %980  ;;  %283 = vrot.lane.b32.xlu0 %v1151_v54, %s1012_s13  ;;  %990 = vrcp.f32 %v207_v4  ;;  %v208_v15 = vadd.f32 1.0, %v979_v5 }
  0x3e   : > { %v983_v16 = vpop.eup %982  ;;  %303 = vrot.lane.b32.xlu1 %v1155_v55, %s1012_s13  ;;  %992 = vrcp.f32 %v217_v9  ;;  %v218_v17 = vadd.f32 1.0, %v981_v10 }
  0x3f   : > { %v985_v19 = vpop.eup %984  ;;  %994 = vrcp.f32 %v208_v15  ;;  %v209_v20 = vadd.f32 1.0, %v983_v16 }
  0x40   : > { %v1173_v21 = vpop.eup %986  ;;  %996 = vrcp.f32 %v218_v17  ;;  %v219_v26 = vadd.f32 1.0, %v985_v19 }
  0x41   : > { %285 = vrot.lane.b32.xlu0 %v1159_v57, %s1012_s13  ;;  %998 = vrcp.f32 %v209_v20 }
  0x42   : > { %305 = vrot.lane.b32.xlu1 %v1161_v58, %s1012_s13  ;;  %1000 = vrcp.f32 %v219_v26 }
  0x45   : > { %287 = vrot.lane.b32.xlu0 %v1173_v21, %s1012_s13 }
  0x46   : > { %v1179_v27 = vpop.eup %988 }
  0x47   : > { %v1181_v28 = vpop.eup %990  ;;  %307 = vrot.lane.b32.xlu1 %v1179_v27, %s1012_s13 }
  0x48   : > { %v1185_v29 = vpop.eup %992 }
  0x49   : > { %289 = vrot.lane.b32.xlu0 %v1181_v28, %s1012_s13  ;;  %v1189_v30 = vpop.eup %994 }
  0x4a   : > { %v1193_v32 = vpop.eup %996 }
  0x4b   : > { %309 = vrot.lane.b32.xlu1 %v1185_v29, %s1012_s13  ;;  %v1197_v33 = vpop.eup %998 }
  0x4c   : > { %v1201_v35 = vpop.eup %1000 }
  0x4d   : > { %291 = vrot.lane.b32.xlu0 %v1189_v30, %s1012_s13 }
  0x4f   : > { %311 = vrot.lane.b32.xlu1 %v1193_v32, %s1012_s13 }
  0x51   : > { %293 = vrot.lane.b32.xlu0 %v1197_v33, %s1012_s13 }
  0x53   : > { %313 = vrot.lane.b32.xlu1 %v1201_v35, %s1012_s13 }
  0x9f   : > { %v276_v37 = vpop.permute.xlu0 %275 }
  0xa0   : > { %877 = vmatprep.mubr.msk.f32.mxu0 %vm315_vm5, %v276_v37  ;;  %v278_v38 = vpop.permute.xlu1 %277 }
  0xa1   : > { %878 = vmatmul.mubr.msk.f32.vlgmr.msra.gmra.mrb[0].mxu0 %vm315_vm5, %v278_v38 }
  0xa3   : > { %v296_v40 = vpop.permute.xlu0 %295 }
  0xa4   : > { %892 = vmatprep.mubr.msk.f32.mxu1 %vm315_vm5, %v296_v40  ;;  %v298_v41 = vpop.permute.xlu1 %297 }
  0xa5   : > { %893 = vmatmul.mubr.msk.f32.vlgmr.msra.gmra.mrb[0].mxu1 %vm315_vm5, %v298_v41 }
  0xa7   : > { %v280_v43 = vpop.permute.xlu0 %279 }
  0xa8   : > { %880 = vmatprep.mubr.msk.f32.mxu0 %vm315_vm5, %v280_v43  ;;  %v300_v45 = vpop.permute.xlu1 %299 }
  0xa9   : > { %895 = vmatprep.mubr.msk.f32.mxu1 %vm315_vm5, %v300_v45 }
  0xab   : > { %v282_v46 = vpop.permute.xlu0 %281 }
  0xac   : > { %881 = vmatmul.mubr.msk.f32.gmra.mrb[2].mxu0 %vm315_vm5, %v282_v46  ;;  %v302_v47 = vpop.permute.xlu1 %301 }
  0xad   : > { %896 = vmatmul.mubr.msk.f32.gmra.mrb[2].mxu1 %vm315_vm5, %v302_v47 }
  0xaf   : > { %v284_v49 = vpop.permute.xlu0 %283 }
  0xb0   : > { %883 = vmatprep.mubr.msk.f32.mxu0 %vm315_vm5, %v284_v49  ;;  %v304_v53 = vpop.permute.xlu1 %303 }
  0xb1   : > { %898 = vmatprep.mubr.msk.f32.mxu1 %vm315_vm5, %v304_v53 }
  0xb3   : > { %v286_v59 = vpop.permute.xlu0 %285 }
  0xb4   : > { %884 = vmatmul.mubr.msk.f32.gmra.mrb[4].mxu0 %vm315_vm5, %v286_v59  ;;  %v306_v61 = vpop.permute.xlu1 %305 }
  0xb5   : > { %899 = vmatmul.mubr.msk.f32.gmra.mrb[4].mxu1 %vm315_vm5, %v306_v61 }
  0xb7   : > { %v288_v62 = vpop.permute.xlu0 %287 }
  0xb8   : > { %886 = vmatprep.mubr.msk.f32.mxu0 %vm315_vm5, %v288_v62 }
  0xb9   : > { %v308_v63 = vpop.permute.xlu1 %307 }
  0xba   : > { %901 = vmatprep.mubr.msk.f32.mxu1 %vm315_vm5, %v308_v63 }
  0xbb   : > { %v290_v4 = vpop.permute.xlu0 %289 }
  0xbc   : > { %887 = vmatmul.mubr.msk.f32.gmra.mrb[6].mxu0 %vm315_vm5, %v290_v4 }
  0xbd   : > { %v310_v5 = vpop.permute.xlu1 %309 }
  0xbe   : > { %902 = vmatmul.mubr.msk.f32.gmra.mrb[6].mxu1 %vm315_vm5, %v310_v5 }
  0xbf   : > { %v292_v9 = vpop.permute.xlu0 %291 }
  0xc0   : > { %889 = vmatprep.mubr.msk.f32.mxu0 %vm315_vm5, %v292_v9 }
  0xc1   : > { %v312_v10 = vpop.permute.xlu1 %311 }
  0xc2   : > { %904 = vmatprep.mubr.msk.f32.mxu1 %vm315_vm5, %v312_v10 }
  0xc3   : > { %v294_v15 = vpop.permute.xlu0 %293 }
  0xc4   : > { %890 = vmatmul.mubr.msk.f32.gmra.mrb[8].mxu0 %vm315_vm5, %v294_v15 }
  0xc5   : > { %v314_v16 = vpop.permute.xlu1 %313 }
  0xc6   : > { %905 = vmatmul.mubr.msk.f32.gmra.mrb[8].mxu1 %vm315_vm5, %v314_v16 }
 0x174   : > { %v879_v17 = vpop.f32.mrb[0].mxu0 }
 0x175   : > { %v426_v19 = vpop.f32.mrb[1].mxu0  ;;  %567 = vrot.lane.b32.xlu1 %v879_v17, %s1013_s14 }
 0x176   : > { %565 = vrot.lane.b32.xlu0 %v426_v19, %s1013_s14 }
 0x178   : > { %v894_v20 = vpop.f32.mrb[0].mxu1 }
 0x179   : > { %v476_v26 = vpop.f32.mrb[1].mxu1  ;;  %587 = vrot.lane.b32.xlu1 %v894_v20, %s1013_s14 }
 0x17a   : > { %585 = vrot.lane.b32.xlu0 %v476_v26, %s1013_s14 }
 0x17f   : > { %v882_v37 = vpop.f32.mrb[2].mxu0 }
 0x180   : > { %571 = vrot.lane.b32.xlu1 %v882_v37, %s1013_s14  ;;  %v436_v38 = vpop.f32.mrb[3].mxu0  ;;  %v897_v40 = vpop.f32.mrb[2].mxu1 }
 0x181   : > { %569 = vrot.lane.b32.xlu0 %v436_v38, %s1013_s14  ;;  %v486_v41 = vpop.f32.mrb[3].mxu1 }
 0x184   : > { %591 = vrot.lane.b32.xlu1 %v897_v40, %s1013_s14 }
 0x185   : > { %589 = vrot.lane.b32.xlu0 %v486_v41, %s1013_s14 }
 0x187   : > { %v885_v43 = vpop.f32.mrb[4].mxu0 }
 0x188   : > { %575 = vrot.lane.b32.xlu1 %v885_v43, %s1013_s14  ;;  %v446_v45 = vpop.f32.mrb[5].mxu0  ;;  %v900_v46 = vpop.f32.mrb[4].mxu1 }
 0x189   : > { %573 = vrot.lane.b32.xlu0 %v446_v45, %s1013_s14  ;;  %v496_v47 = vpop.f32.mrb[5].mxu1 }
 0x18c   : > { %595 = vrot.lane.b32.xlu1 %v900_v46, %s1013_s14 }
 0x18d   : > { %593 = vrot.lane.b32.xlu0 %v496_v47, %s1013_s14 }
 0x18f   : > { %v888_v49 = vpop.f32.mrb[6].mxu0 }
 0x190   : > { %579 = vrot.lane.b32.xlu1 %v888_v49, %s1013_s14  ;;  %v456_v53 = vpop.f32.mrb[7].mxu0 }
 0x191   : > { %577 = vrot.lane.b32.xlu0 %v456_v53, %s1013_s14  ;;  %v903_v59 = vpop.f32.mrb[6].mxu1 }
 0x192   : > { %v506_v61 = vpop.f32.mrb[7].mxu1 }
 0x194   : > { %599 = vrot.lane.b32.xlu1 %v903_v59, %s1013_s14 }
 0x195   : > { %597 = vrot.lane.b32.xlu0 %v506_v61, %s1013_s14 }
 0x197   : > { %v891_v62 = vpop.f32.mrb[8].mxu0 }
 0x198   : > { %583 = vrot.lane.b32.xlu1 %v891_v62, %s1013_s14  ;;  %v466_v63 = vpop.f32.mrb[9].mxu0 }
 0x199   : > { %581 = vrot.lane.b32.xlu0 %v466_v63, %s1013_s14  ;;  %v906_v4 = vpop.f32.mrb[8].mxu1 }
 0x19a   : > { %v516_v5 = vpop.f32.mrb[9].mxu1 }
 0x19c   : > { %603 = vrot.lane.b32.xlu1 %v906_v4, %s1013_s14 }
 0x19d   : > { %601 = vrot.lane.b32.xlu0 %v516_v5, %s1013_s14 }
 0x1e7   : > { %v568_v9 = vpop.permute.xlu1 %567 }
 0x1e8   : > { %v626_v10 = vmul.f32 %v568_v9, %v1047_v1  ;;  %v566_v15 = vpop.permute.xlu0 %565 }
 0x1e9   : > { %v625_v16 = vmul.f32 %v566_v15, %v1044_v0 }
 0x1ea   : > { %667 = vrot.lane.b32.xlu1 %v626_v10, %s1014_s15 }
 0x1eb   : > { %665 = vrot.lane.b32.xlu0 %v625_v16, %s1014_s15  ;;  %v588_v17 = vpop.permute.xlu1 %587 }
 0x1ec   : > { %v636_v19 = vmul.f32 %v588_v17, %v1056_v6  ;;  %v586_v20 = vpop.permute.xlu0 %585 }
 0x1ed   : > { %v635_v26 = vmul.f32 %v586_v20, %v1050_v2 }
 0x1ee   : > { %687 = vrot.lane.b32.xlu1 %v636_v19, %s1014_s15 }
 0x1ef   : > { %685 = vrot.lane.b32.xlu0 %v635_v26, %s1014_s15 }
 0x1f2   : > { %v572_v37 = vpop.permute.xlu1 %571 }
 0x1f3   : > { %v628_v38 = vmul.f32 %v572_v37, %v1068_v12  ;;  %v570_v40 = vpop.permute.xlu0 %569 }
 0x1f4   : > { %v627_v41 = vmul.f32 %v570_v40, %v1059_v7 }
 0x1f5   : > { %671 = vrot.lane.b32.xlu1 %v628_v38, %s1014_s15 }
 0x1f6   : > { %v592_v43 = vpop.permute.xlu1 %591  ;;  %669 = vrot.lane.b32.xlu0 %v627_v41, %s1014_s15 }
 0x1f7   : > { %v638_v45 = vmul.f32 %v592_v43, %v1071_v13  ;;  %v590_v46 = vpop.permute.xlu0 %589 }
 0x1f8   : > { %v637_v47 = vmul.f32 %v590_v46, %v1062_v8 }
 0x1f9   : > { %691 = vrot.lane.b32.xlu1 %v638_v45, %s1014_s15 }
 0x1fa   : > { %v576_v49 = vpop.permute.xlu1 %575  ;;  %689 = vrot.lane.b32.xlu0 %v637_v47, %s1014_s15 }
 0x1fb   : > { %v630_v53 = vmul.f32 %v576_v49, %v1083_v24  ;;  %v574_v59 = vpop.permute.xlu0 %573  ;;  %v526_v49 = vmul.f32 %v1128_v39, %v1047_v1  ;;  %v536_v1 = vmul.f32 %v1137_v44, %v1056_v6  ;;  %v528_v6 = vmul.f32 %v1147_v51, %v1068_v12 }
 0x1fc   : > { %v629_v61 = vmul.f32 %v574_v59, %v1074_v14  ;;  %v530_v51 = vmul.f32 %v1159_v57, %v1083_v24  ;;  %v539_v57 = vmul.f32 %v1155_v55, %v1080_v23 }
 0x1fd   : > { %675 = vrot.lane.b32.xlu1 %v630_v53, %s1014_s15  ;;  %v525_v53 = vmul.f32 %v1125_v36, %v1044_v0  ;;  %v535_v36 = vmul.f32 %v1133_v42, %v1050_v2  ;;  %v527_v2 = vmul.f32 %v1139_v48, %v1059_v7 }
 0x1fe   : > { %v596_v62 = vpop.permute.xlu1 %595  ;;  %673 = vrot.lane.b32.xlu0 %v629_v61, %s1014_s15 }
 0x1ff   : > { %v640_v63 = vmul.f32 %v596_v62, %v1086_v25  ;;  %v594_v4 = vpop.permute.xlu0 %593 }
 0x200   : > { %v639_v5 = vmul.f32 %v594_v4, %v1080_v23 }
 0x201   : > { %695 = vrot.lane.b32.xlu1 %v640_v63, %s1014_s15 }
 0x202   : > { %v580_v9 = vpop.permute.xlu1 %579  ;;  %693 = vrot.lane.b32.xlu0 %v639_v5, %s1014_s15 }
 0x203   : > { %v632_v10 = vmul.f32 %v580_v9, %v1099_v60  ;;  %v578_v15 = vpop.permute.xlu0 %577 }
 0x204   : > { %v631_v16 = vmul.f32 %v578_v15, %v1092_v34 }
 0x205   : > { %679 = vrot.lane.b32.xlu1 %v632_v10, %s1014_s15  ;;  %v538_v10 = vmul.f32 %v1149_v52, %v1071_v13  ;;  %v529_v52 = vmul.f32 %v1151_v54, %v1074_v14 }
 0x206   : > { %v600_v17 = vpop.permute.xlu1 %599  ;;  %677 = vrot.lane.b32.xlu0 %v631_v16, %s1014_s15  ;;  %v537_v16 = vmul.f32 %v1143_v50, %v1062_v8 }
 0x207   : > { %v642_v19 = vmul.f32 %v600_v17, %v1102_v3  ;;  %v598_v20 = vpop.permute.xlu0 %597 }
 0x208   : > { %v641_v26 = vmul.f32 %v598_v20, %v1096_v56 }
 0x209   : > { %699 = vrot.lane.b32.xlu1 %v642_v19, %s1014_s15  ;;  %v540_v19 = vmul.f32 %v1161_v58, %v1086_v25  ;;  %v531_v58 = vmul.f32 %v1173_v21, %v1092_v34 }
 0x20a   : > { %v584_v37 = vpop.permute.xlu1 %583  ;;  %697 = vrot.lane.b32.xlu0 %v641_v26, %s1014_s15  ;;  %v532_v26 = vmul.f32 %v1181_v28, %v1099_v60  ;;  %v541_v28 = vmul.f32 %v1179_v27, %v1096_v56 }
 0x20b   : > { %v634_v38 = vmul.f32 %v584_v37, %v1114_v22  ;;  %v582_v40 = vpop.permute.xlu0 %581 }
 0x20c   : > { %v633_v41 = vmul.f32 %v582_v40, %v1106_v11 }
 0x20d   : > { %683 = vrot.lane.b32.xlu1 %v634_v38, %s1014_s15  ;;  %v542_v38 = vmul.f32 %v1185_v29, %v1102_v3  ;;  %v533_v29 = vmul.f32 %v1189_v30, %v1106_v11 }
 0x20e   : > { %v604_v43 = vpop.permute.xlu1 %603  ;;  %681 = vrot.lane.b32.xlu0 %v633_v41, %s1014_s15  ;;  %v534_v41 = vmul.f32 %v1197_v33, %v1114_v22  ;;  %v543_v33 = vmul.f32 %v1193_v32, %v1110_v18 }
 0x20f   : > { %v644_v45 = vmul.f32 %v604_v43, %v1118_v31  ;;  %v602_v46 = vpop.permute.xlu0 %601 }
 0x210   : > { %v643_v47 = vmul.f32 %v602_v46, %v1110_v18 }
 0x211   : > { %703 = vrot.lane.b32.xlu1 %v644_v45, %s1014_s15  ;;  %v544_v45 = vmul.f32 %v1201_v35, %v1118_v31 }
 0x212   : > { %701 = vrot.lane.b32.xlu0 %v643_v47, %s1014_s15 }
 0x25c   : > { %v668_v59 = vpop.permute.xlu1 %667 }
 0x25d   : > { %v727_v61 = vsel %vm725_vm6, %v526_v49, %v668_v59  ;;  %v666_v62 = vpop.permute.xlu0 %665 }
 0x25e   : > { %748 = vst.msk [vmem:[%s1296_s18 + $0x8] sm:$0xff] %vm746_vm7, %v727_v61  ;;  %v726_v0 = vsel %vm725_vm6, %v525_v53, %v666_v62 }
 0x25f   : > { %747 = vst.msk [vmem:[%s1296_s18] sm:$0xff] %vm746_vm7, %v726_v0 }
 0x260   : > { %v688_v39 = vpop.permute.xlu1 %687 }
 0x261   : > { %v737_v63 = vsel %vm725_vm6, %v536_v1, %v688_v39  ;;  %v686_v4 = vpop.permute.xlu0 %685 }
 0x262   : > { %758 = vst.msk [vmem:[%s1296_s18 + $0x58] sm:$0xff] %vm746_vm7, %v737_v63  ;;  %v736_v5 = vsel %vm725_vm6, %v535_v36, %v686_v4 }
 0x263   : > { %757 = vst.msk [vmem:[%s1296_s18 + $0x50] sm:$0xff] %vm746_vm7, %v736_v5 }
 0x267   : > { %v672_v42 = vpop.permute.xlu1 %671 }
 0x268   : > { %v729_v44 = vsel %vm725_vm6, %v528_v6, %v672_v42  ;;  %v670_v9 = vpop.permute.xlu0 %669 }
 0x269   : > { %750 = vst.msk [vmem:[%s1296_s18 + $0x18] sm:$0xff] %vm746_vm7, %v729_v44  ;;  %v728_v15 = vsel %vm725_vm6, %v527_v2, %v670_v9 }
 0x26a   : > { %749 = vst.msk [vmem:[%s1296_s18 + $0x10] sm:$0xff] %vm746_vm7, %v728_v15 }
 0x26b   : > { %v692_v7 = vpop.permute.xlu1 %691 }
 0x26c   : > { %v739_v12 = vsel %vm725_vm6, %v538_v10, %v692_v7  ;;  %v690_v48 = vpop.permute.xlu0 %689 }
 0x26d   : > { %760 = vst.msk [vmem:[%s1296_s18 + $0x68] sm:$0xff] %vm746_vm7, %v739_v12  ;;  %v738_v13 = vsel %vm725_vm6, %v537_v16, %v690_v48 }
 0x26e   : > { %759 = vst.msk [vmem:[%s1296_s18 + $0x60] sm:$0xff] %vm746_vm7, %v738_v13 }
 0x26f   : > { %v676_v8 = vpop.permute.xlu1 %675 }
 0x270   : > { %v731_v50 = vsel %vm725_vm6, %v530_v51, %v676_v8  ;;  %v674_v17 = vpop.permute.xlu0 %673 }
 0x271   : > { %752 = vst.msk [vmem:[%s1296_s18 + $0x28] sm:$0xff] %vm746_vm7, %v731_v50  ;;  %v730_v24 = vsel %vm725_vm6, %v529_v52, %v674_v17 }
 0x272   : > { %751 = vst.msk [vmem:[%s1296_s18 + $0x20] sm:$0xff] %vm746_vm7, %v730_v24 }
 0x273   : > { %v696_v14 = vpop.permute.xlu1 %695 }
 0x274   : > { %v741_v54 = vsel %vm725_vm6, %v540_v19, %v696_v14  ;;  %v694_v20 = vpop.permute.xlu0 %693 }
 0x275   : > { %762 = vst.msk [vmem:[%s1296_s18 + $0x78] sm:$0xff] %vm746_vm7, %v741_v54  ;;  %v740_v25 = vsel %vm725_vm6, %v539_v57, %v694_v20 }
 0x276   : > { %761 = vst.msk [vmem:[%s1296_s18 + $0x70] sm:$0xff] %vm746_vm7, %v740_v25 }
 0x277   : > { %v680_v23 = vpop.permute.xlu1 %679 }
 0x278   : > { %v733_v55 = vsel %vm725_vm6, %v532_v26, %v680_v23  ;;  %v678_v37 = vpop.permute.xlu0 %677 }
 0x279   : > { %754 = vst.msk [vmem:[%s1296_s18 + $0x38] sm:$0xff] %vm746_vm7, %v733_v55  ;;  %v732_v60 = vsel %vm725_vm6, %v531_v58, %v678_v37 }
 0x27a   : > { %753 = vst.msk [vmem:[%s1296_s18 + $0x30] sm:$0xff] %vm746_vm7, %v732_v60 }
 0x27b   : > { %v700_v34 = vpop.permute.xlu1 %699 }
 0x27c   : > { %v743_v21 = vsel %vm725_vm6, %v542_v38, %v700_v34  ;;  %v698_v40 = vpop.permute.xlu0 %697 }
 0x27d   : > { %764 = vst.msk [vmem:[%s1296_s18 + $0x88] sm:$0xff] %vm746_vm7, %v743_v21  ;;  %v742_v3 = vsel %vm725_vm6, %v541_v28, %v698_v40 }
 0x27e   : > { %763 = vst.msk [vmem:[%s1296_s18 + $0x80] sm:$0xff] %vm746_vm7, %v742_v3 }
 0x27f   : > { %v684_v56 = vpop.permute.xlu1 %683 }
 0x280   : > { %v735_v27 = vsel %vm725_vm6, %v534_v41, %v684_v56  ;;  %v682_v43 = vpop.permute.xlu0 %681 }
 0x281   : > { %756 = vst.msk [vmem:[%s1296_s18 + $0x48] sm:$0xff] %vm746_vm7, %v735_v27  ;;  %v734_v22 = vsel %vm725_vm6, %v533_v29, %v682_v43 }
 0x282   : > { %755 = vst.msk [vmem:[%s1296_s18 + $0x40] sm:$0xff] %vm746_vm7, %v734_v22 }
 0x283   : > { %v704_v46 = vpop.permute.xlu1 %703 }
 0x284   : > { %v745_v11 = vsel %vm725_vm6, %v544_v45, %v704_v46  ;;  %v702_v30 = vpop.permute.xlu0 %701 }
 0x285   : > { %766 = vst.msk [vmem:[%s1296_s18 + $0x98] sm:$0xff] %vm746_vm7, %v745_v11  ;;  %v744_v47 = vsel %vm725_vm6, %v543_v33, %v702_v30 }
 0x286   : > { %765 = vst.msk [vmem:[%s1296_s18 + $0x90] sm:$0xff] %vm746_vm7, %v744_v47 }
 0x287 PF: > { %s11_s6 = sadd.s32 1, %s1008_s6  }
 0x288   : > { %p8_p4 = scmp.ge.s32.totalorder %s11_s6, 4  }
 0x28a   :  { %10 = sbr.rel (!%p8_p4) target bundleno = 1 (0x1), region = 54 }

</bundles_post_ra>
